<compile_context>
chip_gen: v7x
topology: tpu7x:2x2x1
jax: 0.10.0
libtpu: 0.0.40
codegen_flags: <defaults>
</compile_context>

<pallas_src>
import functools

import jax
import jax.numpy as jnp
from jax.experimental import pallas as pl
from jax.experimental.pallas import tpu as pltpu

_SUBLANE = 8
_FWD_TM_CAP = 1024          # forward M-tile cap (HBM-bound: amortize grid-step cost)
_ROLLOUT_VMEM_BUDGET = 8 << 20   # bytes for the double-buffered rollout output block


def _round_up(n, m):
    return ((n + m - 1) // m) * m


# ---------------------------------------------------------------------------
# Kernels
# ---------------------------------------------------------------------------
def _dynamics_step_kernel(x_ref, wt_ref, o_ref):
    # y = x @ W^T, with W^T pre-materialized at init time -> clean MXU matmul.
    acc = jnp.dot(x_ref[...], wt_ref[...], preferred_element_type=jnp.float32)
    o_ref[...] = acc.astype(o_ref.dtype)


def _dynamics_rollout_kernel(x_ref, wt_ref, o_ref):
    # Fused Koopman rollout for one batch tile: W^T stays resident in VMEM,
    # the state is carried in f32, each step's result is written to o_ref[t].
    wt = wt_ref[...]
    steps = o_ref.shape[0]
    state0 = x_ref[...].astype(jnp.float32)

    def body(t, state):
        y = jnp.dot(state, wt, preferred_element_type=jnp.float32)
        o_ref[t] = y.astype(o_ref.dtype)
        return y                      # keep the carried state in f32

    jax.lax.fori_loop(0, steps, body, state0, unroll=steps <= 32)


# ---------------------------------------------------------------------------
# Parameter init (done once, OUTSIDE the forward path)
# ---------------------------------------------------------------------------
def init_dynamics_weight(key, b, init_scale):
    """Replica (in distribution) of gaussian_init_ + SVD orthogonalization."""
    # gaussian_init_: Normal(0, std=1/b) over (b, b)
    omega = jax.random.normal(key, (b, b), dtype=jnp.float32) * (1.0 / b)
    # torch.svd: A = U S V^T;  W = (U @ V^T) * init_scale  (polar factor)
    u, _, vh = jnp.linalg.svd(omega, full_matrices=False)
    return ((u @ vh) * init_scale).astype(jnp.float32)


def prepare_weight(w, dtype=None):
    """Pre-transpose W once at init: kernels compute x @ W^T as x @ Wt.

    Optionally cast to bf16 here for v5e/v6e/v7x MXU throughput and halved
    HBM traffic (f32 accumulation is preserved inside the kernels).
    """
    wt = jnp.asarray(w).T
    if dtype is not None:
        wt = wt.astype(dtype)
    return wt


# ---------------------------------------------------------------------------
# Wrappers
# ---------------------------------------------------------------------------
def _batch_tiling(batch, tm_cap):
    """Pick (padded_batch, tile_m). No feature padding, minimal row padding."""
    if batch <= tm_cap:
        return batch, batch              # single block; full-dim block is legal
    batch_p = _round_up(batch, _SUBLANE)
    return batch_p, tm_cap               # partial trailing block handled by Pallas


@jax.jit
def dynamics_forward(x, w_t):
    """One application: y = x @ W^T  (x: (batch, b)) — matches Dynamics.forward."""
    batch, b = x.shape
    batch_p, tm = _batch_tiling(batch, _FWD_TM_CAP)
    x_p = jnp.pad(x, ((0, batch_p - batch), (0, 0))) if batch_p != batch else x

    y = pl.pallas_call(
        _dynamics_step_kernel,
        out_shape=jax.ShapeDtypeStruct((batch_p, b), x.dtype),
        grid=(pl.cdiv(batch_p, tm),),
        in_specs=[
            pl.BlockSpec((tm, b), lambda i: (i, 0)),    # x row-tile
            pl.BlockSpec((b, b), lambda i: (0, 0)),     # W^T resident (same block)
        ],
        out_specs=pl.BlockSpec((tm, b), lambda i: (i, 0)),
        compiler_params=pltpu.CompilerParams(
            dimension_semantics=("parallel",),          # v7x: split rows across TCs
        ),
    )(x_p, w_t)
    return y[:batch] if batch_p != batch else y


@functools.partial(jax.jit, static_argnames=("steps",))
def dynamics_rollout(x, w_t, *, steps):
    """Fused repeated application: [x W^T, x (W^T)^2, ..., x (W^T)^steps]."""
    batch, b = x.shape
    out_dtype = x.dtype

    # Cap the batch tile so the double-buffered (steps, tm, b) output block
    # stays well inside scoped VMEM on all generations (incl. v7x's 64 MiB).
    out_bytes_per_row = steps * b * jnp.dtype(out_dtype).itemsize
    tm_cap = (_ROLLOUT_VMEM_BUDGET // (2 * max(out_bytes_per_row, 1)))
    tm_cap = max(_SUBLANE, min(_FWD_TM_CAP, (tm_cap // _SUBLANE) * _SUBLANE))

    batch_p, tm = _batch_tiling(batch, tm_cap)
    x_p = jnp.pad(x, ((0, batch_p - batch), (0, 0))) if batch_p != batch else x

    ys = pl.pallas_call(
        _dynamics_rollout_kernel,
        out_shape=jax.ShapeDtypeStruct((steps, batch_p, b), out_dtype),
        grid=(pl.cdiv(batch_p, tm),),
        in_specs=[
            pl.BlockSpec((tm, b), lambda i: (i, 0)),            # x row-tile
            pl.BlockSpec((b, b), lambda i: (0, 0)),             # W^T resident
        ],
        out_specs=pl.BlockSpec((steps, tm, b), lambda i: (0, i, 0)),
        compiler_params=pltpu.CompilerParams(
            dimension_semantics=("parallel",),                  # batch rows independent
        ),
    )(x_p, w_t)
    return ys[:, :batch, :] if batch_p != batch else ys


if __name__ == "__main__":
    key = jax.random.PRNGKey(0)
    k_w, k_x = jax.random.split(key)

    b = 32            # latent ("bottleneck") dimension of the Koopman operator
    batch = 8
    steps = 4
    init_scale = 1.0

    w = init_dynamics_weight(k_w, b, init_scale)   # (b, b) module weight
    w_t = prepare_weight(w)                        # W^T, materialized ONCE at init

    x = jax.random.normal(k_x, (batch, b), dtype=jnp.float32)

    # --- single application (exactly Dynamics.forward) ---
    y = jax.block_until_ready(dynamics_forward(x, w_t))
    y_ref = x @ w.T
    assert y.shape == (batch, b)
    assert jnp.allclose(y, y_ref, atol=1e-5, rtol=1e-5)

    # --- fused multi-step application (how Dynamics is used in a rollout) ---
    ys = jax.block_until_ready(dynamics_rollout(x, w_t, steps=steps))
    ref_state, refs = x, []
    for _ in range(steps):
        ref_state = ref_state @ w.T
        refs.append(ref_state)
    refs = jnp.stack(refs)
    assert ys.shape == (steps, batch, b)
    assert jnp.allclose(ys, refs, atol=1e-4, rtol=1e-4)

    print("KERNEL_OK")
</pallas_src>

<mosaic_0001>
module attributes {stable_mosaic.version = 11 : i64} {
  func.func @_dynamics_step_kernel(%arg0: i32, %arg1: memref<8x32xf32, #tpu.memory_space<vmem>>, %arg2: memref<32x32xf32, #tpu.memory_space<vmem>>, %arg3: memref<8x32xf32, #tpu.memory_space<vmem>>) attributes {dimension_semantics = [#tpu.dimension_semantics<parallel>], iteration_bounds = array<i64: 1>, scalar_prefetch = 0 : i64, scratch_operands = 0 : i64, tpu.core_type = #tpu.core_type<tc>, window_params = [{transform_indices = @transform_0, window_bounds = array<i64: 8, 32>}, {pipeline_mode = #tpu.pipeline_mode<synchronous>, transform_indices = @transform_1, window_bounds = array<i64: 32, 32>}, {transform_indices = @transform_2, window_bounds = array<i64: 8, 32>}]} {
    %c0 = arith.constant 0 : index
    %c0_0 = arith.constant 0 : index
    %0 = vector.load %arg1[%c0, %c0_0] : memref<8x32xf32, #tpu.memory_space<vmem>>, vector<8x32xf32>
    %c0_1 = arith.constant 0 : index
    %c0_2 = arith.constant 0 : index
    %1 = vector.load %arg2[%c0_1, %c0_2] : memref<32x32xf32, #tpu.memory_space<vmem>>, vector<32x32xf32>
    %cst = arith.constant dense<0.000000e+00> : vector<8x32xf32>
    %2 = tpu.matmul %0, %1, %cst {dimension_numbers = #tpu.dot_dimension_numbers<[1], [0], [0], [1], [0, 0, 1, 1], [], []>} : vector<8x32xf32>, vector<32x32xf32>, vector<8x32xf32> -> vector<8x32xf32>
    %c0_3 = arith.constant 0 : index
    %c0_4 = arith.constant 0 : index
    %3 = vector.load %arg3[%c0_3, %c0_4] : memref<8x32xf32, #tpu.memory_space<vmem>>, vector<8x32xf32>
    tpu.vector_store %arg3[%c0_3, %c0_4], %2 {strides = array<i32>} : memref<8x32xf32, #tpu.memory_space<vmem>>, vector<8x32xf32>,
    return
  }
  func.func @transform_0(%arg0: i32) -> (i32, i32) {
    %c0_i32 = arith.constant 0 : i32
    %c0_i32_0 = arith.constant 0 : i32
    return %arg0, %c0_i32 : i32, i32
  }
  func.func @transform_1(%arg0: i32) -> (i32, i32) {
    %c0_i32 = arith.constant 0 : i32
    %c0_i32_0 = arith.constant 0 : i32
    %c0_i32_1 = arith.constant 0 : i32
    return %c0_i32, %c0_i32_0 : i32, i32
  }
  func.func @transform_2(%arg0: i32) -> (i32, i32) {
    %c0_i32 = arith.constant 0 : i32
    %c0_i32_0 = arith.constant 0 : i32
    return %arg0, %c0_i32 : i32, i32
  }
}

</mosaic_0001>

<bundles_post_ra>
// kernel: dynamics_forward.1
= control target key start
LH: loop header
LB: loop body
LE: loop exit
PB: predicated region body
PF: predicated region fallthrough
CT: control target
= control target key end

     0   :  { %7 = vsyncpa [#allocation3], 0  ;;  %s303_s0 = inlined_call_operand.hbm [shape: f32[8,32], index: 0, kind: input, shape index: {}]   ;;  %s304_s1 = inlined_call_operand.hbm [shape: f32[32,32], index: 1, kind: input, shape index: {}]   ;;  %s305_s2 = inlined_call_operand.hbm [shape: f32[8,32], index: 2, kind: output, shape index: {}]  }
   0x1   :  { %8 = vsyncpa [#allocation6], 0 }
   0x2   :  { %9 = vsyncpa [#allocation4], 0  ;;  %s237_s9 = smov [#allocation2]   ;;  %s238_s11 = smov [#allocation5]  }
   0x3   :  { %s16_s10 = sshll.u32 %s237_s9, 4  ;;  %s25_s12 = sshll.u32 %s238_s11, 4  ;;  %s17_s10 = int_to_ptr.vmem [resolvable:$true] %s16_s10  ;;  %s260_s12 = int_to_ptr.vmem [resolvable:$true] %s25_s12 }
   0x4   :  { %s165_s15 = scalar_lea.hbm %s303_s0, 128 }
   0x5   :  { %p166_p0 = scmp.ne.s32.totalorder %s303_s0, %s165_s15  ;;  %p169_p1 = scmp.lt.u32.totalorder %s165_s15, %s303_s0 }
   0x7   :  { %p171_p2 = pnand %p169_p1, %p166_p0 }
   0x9   :  { %174 = shalt.err (!%p171_p2)
}
   0xa   :  { %s175_s20 = scalar_lea.vmem %s17_s10, 128  ;;  %p180_p4 = scmp.lt.s32.totalorder %s17_s10, %s17_s10 }
   0xb   :  { %p176_p3 = scmp.ne.s32.totalorder %s17_s10, %s175_s20  ;;  %p181_p5 = scmp.lt.s32.totalorder %s175_s20, %s175_s20 }
   0xd   :  { %p182_p6 = por %p181_p5, %p180_p4 }
   0xf   :  { %p183_p7 = pnand %p182_p6, %p176_p3 }
  0x11   :  { %186 = shalt.err (!%p183_p7)
}
  0x12   :  { %19 = dma.hbm_to_vmem [thread:$0]  %s303_s0, 128, %s17_s10, [#allocation3]  }
  0x13   :  { %s187_s25 = scalar_lea.hbm %s304_s1, 512 }
  0x14   :  { %p188_p8 = scmp.ne.s32.totalorder %s304_s1, %s187_s25  ;;  %p191_p9 = scmp.lt.u32.totalorder %s187_s25, %s304_s1 }
  0x16   :  { %p193_p10 = pnand %p191_p9, %p188_p8 }
  0x18   :  { %196 = shalt.err (!%p193_p10)
}
  0x19   :  { %s197_s30 = scalar_lea.vmem %s260_s12, 512  ;;  %p202_p12 = scmp.lt.s32.totalorder %s260_s12, %s260_s12 }
  0x1a   :  { %p198_p11 = scmp.ne.s32.totalorder %s260_s12, %s197_s30  ;;  %p203_p13 = scmp.lt.s32.totalorder %s197_s30, %s197_s30 }
  0x1c   :  { %p204_p0 = por %p203_p13, %p202_p12 }
  0x1e   :  { %p205_p1 = pnand %p204_p0, %p198_p11 }
  0x20   :  { %208 = shalt.err (!%p205_p1)
}
  0x21   :  { %s239_s0 = smov 128   ;;  %s240_s3 = smov 8  }
  0x22   :  { %31 = dma.hbm_to_vmem [thread:$0]  %s304_s1, 512, %s260_s12, [#allocation6], %s239_s0, %s239_s0, %s240_s3  }
  0x23   :  { %231 = dma.done.wait [#allocation3], 128  }
  0x24   :  { %232 = vsyncadd [#allocation3], 4294967168 }
  0x25   :  { %233 = dma.done.wait [#allocation6], 512  }
  0x26   :  { %234 = vsyncadd [#allocation6], 4294966784  ;;  %v241_v0 = vmov 0.0|0.0   ;;  %vm242_vm0 = vmmov 0   ;;  %v243_v1 = vmov 0.0   ;;  %v39_v2 = vld [vmem:[#allocation5] sm:$0xff] }
  0x27   :  { %151 = vmatprep.subr.bf16.mxu0 %v241_v0  ;;  %148 = vmatprep.mubr.msk.f32.mxu0 %vm242_vm0, %v243_v1  ;;  %v40_v3 = vld [vmem:[#allocation5 + $0x8] sm:$0xff]  ;;  %v41_v4 = vld [vmem:[#allocation5 + $0x10] sm:$0xff]  ;;  %v42_v6 = vld [vmem:[#allocation5 + $0x18] sm:$0xff]  ;;  %vm43_vm1 = vcmask 261120   ;;  %s244_s1 = smov [#allocation7]  }
  0x28   :  { %v152_v5 = vpack.c.bf16 %v40_v3, %v39_v2  ;;  %v155_v7 = vpack.c.bf16 %v42_v6, %v41_v4  ;;  %v38_v8 = vld [vmem:[#allocation2] sm:$0xff]  ;;  %s124_s6 = sshll.u32 %s244_s1, 4  ;;  %s125_s6 = int_to_ptr.vmem [resolvable:$true] %s124_s6 }
  0x29   :  { %s209_s7 = scalar_lea.vmem %s125_s6, 128  ;;  %p214_p3 = scmp.lt.s32.totalorder %s125_s6, %s125_s6 }
  0x2a   :  { %153 = vmatpush3.bf16.msra.mxu0 %v152_v5  ;;  %p210_p2 = scmp.ne.s32.totalorder %s125_s6, %s209_s7  ;;  %p215_p4 = scmp.lt.s32.totalorder %s209_s7, %s209_s7 }
  0x2b   :  { %154 = vmatprep.subr.bf16.mxu0 %v241_v0 }
  0x2c   :  { %p216_p5 = por %p215_p4, %p214_p3 }
  0x2e   :  { %156 = vmatpush3.bf16.msra.mxu0 %v155_v7  ;;  %p217_p6 = pnand %p216_p5, %p210_p2 }
  0x31   :  { %149 = vmatmul.mubr.msk.f32.vlgmr.msra.gmra.mrb[0].mxu0 %vm43_vm1, %v38_v8 }
 0x104   :  { %v113_v9 = vpop.f32.mrb[0].mxu0 }
 0x105   :  { %117 = vst.msk [vmem:[#allocation7] sm:$0xff] %vm43_vm1, %v113_v9  ;;  %v150_v10 = vpop.f32.mrb[1].mxu0 }
 0x106   :  { %220 = shalt.err (!%p217_p6)
}
 0x107   :  { %s221_s10 = scalar_lea.hbm %s305_s2, 128 }
 0x108   :  { %p222_p7 = scmp.ne.s32.totalorder %s305_s2, %s221_s10  ;;  %p225_p8 = scmp.lt.u32.totalorder %s221_s10, %s305_s2 }
 0x10a   :  { %p227_p9 = pnand %p225_p8, %p222_p7 }
 0x10c   :  { %230 = shalt.err (!%p227_p9)
}
 0x10d   :  { %127 = dma.vmem_to_hbm [thread:$0]  %s125_s6, 128, %s305_s2, [#allocation4]  }
 0x10e   :  { %235 = dma.done.wait [#allocation4], 128  }
 0x10f   :  { %236 = vsyncadd [#allocation4], 4294967168 }
 0x110   :  { %131 = vsyncpa [#allocation3], 1 }
 0x111   :  { %132 = vsyncpa [#allocation6], 1 }
 0x112   :  { %133 = vsyncpa [#allocation4], 1 }

</bundles_post_ra>
